<compile_context>
chip_gen: v7x
topology: tpu7x:2x2x1
jax: 0.10.0
libtpu: 0.0.40
codegen_flags: <defaults>
</compile_context>

<pallas_src>
import jax
import jax.numpy as jnp
from jax.experimental import pallas as pl
from jax.experimental.pallas import tpu as pltpu


def _chomp_kernel(x_ref, o_ref):
    # Pure copy of the kept columns.  In the lane-aligned path x_ref already
    # holds only w_out columns, so the static slice is the full block.
    w_out = o_ref.shape[-1]
    o_ref[...] = x_ref[:, :w_out]


def chomp1d(x: jax.Array, chomp_size: int) -> jax.Array:
    """Equivalent of PyTorch Chomp1d.forward for a 4D NCHW tensor."""
    assert x.ndim == 4, "Chomp1d expects a 4D (N, C, H, W) input"
    n, c, h, w = x.shape
    assert 0 < chomp_size < w
    w_out = w - chomp_size

    rows = n * c * h
    x2d = x.reshape(rows, w)

    itemsize = jnp.dtype(x.dtype).itemsize
    # Sublane pack: 8 rows for 4-byte, 16 for 2-byte, 32 for 1-byte dtypes.
    pack = max(8, 32 // itemsize)

    # Skip DMA-ing the chomped tail whenever the kept width is lane-aligned
    # (otherwise the input block must span the full W to satisfy the
    # (8, 128) block-shape rule).
    narrow_input = (w_out % 128 == 0)
    w_block = w_out if narrow_input else w

    # Largest row tile whose double-buffered in+out tiles stay within ~16 MiB
    # of VMEM (fits v5e/v6e 128 MiB and v7x 64 MiB), capped at 2048 rows,
    # always a multiple of the sublane pack.
    vmem_budget = 16 * 1024 * 1024
    per_row_bytes = 2 * (w_block + w_out) * itemsize  # double-buffered in+out
    tile_r = max(pack, min(2048, vmem_budget // per_row_bytes))
    tile_r = (tile_r // pack) * pack
    if rows <= tile_r:
        tile_r = rows  # block row dim == full array dim: always legal
    grid = (pl.cdiv(rows, tile_r),)  # partial edge block handled by Pallas

    out2d = pl.pallas_call(
        _chomp_kernel,
        out_shape=jax.ShapeDtypeStruct((rows, w_out), x.dtype),
        grid_spec=pltpu.PrefetchScalarGridSpec(
            num_scalar_prefetch=0,
            grid=grid,
            in_specs=[pl.BlockSpec((tile_r, w_block), lambda i: (i, 0))],
            out_specs=pl.BlockSpec((tile_r, w_out), lambda i: (i, 0)),
        ),
        compiler_params=pltpu.CompilerParams(
            dimension_semantics=("parallel",),   # shards across both TCs on v7x
            vmem_limit_bytes=32 * 1024 * 1024,   # raise v5e's 16 MiB scoped default
        ),
        cost_estimate=pl.CostEstimate(
            flops=0,
            transcendentals=0,
            bytes_accessed=rows * (w_block + w_out) * itemsize,
        ),
    )(x2d)

    # TODO(synk): when w_out < 128 the store is lane-sparse (masked vst); in a
    # full model this chomp should be fused into the consumer conv/activation.
    return out2d.reshape(n, c, h, w_out)


if __name__ == "__main__":
    key = jax.random.PRNGKey(0)

    # Case 1: module-typical small shape (w_out < 128, full-width input path).
    N, C, H, W = 2, 4, 16, 16
    chomp_size = 4
    x = jax.random.normal(key, (N, C, H, W), dtype=jnp.float32)
    y = jax.block_until_ready(chomp1d(x, chomp_size))
    y_ref = x[:, :, :, :-chomp_size]
    assert y.shape == (N, C, H, W - chomp_size), y.shape
    assert jnp.array_equal(y, y_ref), "Mismatch vs reference slice (case 1)"

    # Case 2: lane-aligned kept width -> narrow-input (tail never DMA'd) path.
    k2 = jax.random.PRNGKey(1)
    x2 = jax.random.normal(k2, (2, 3, 5, 256), dtype=jnp.float32)
    y2 = jax.block_until_ready(chomp1d(x2, 128))
    assert jnp.array_equal(y2, x2[:, :, :, :-128]), "Mismatch (case 2)"

    # Case 3: enough rows to exercise a multi-step grid (rows > tile_r).
    k3 = jax.random.PRNGKey(2)
    x3 = jax.random.normal(k3, (4, 8, 128, 16), dtype=jnp.float32)
    y3 = jax.block_until_ready(chomp1d(x3, 4))
    assert jnp.array_equal(y3, x3[:, :, :, :-4]), "Mismatch (case 3)"

    print("KERNEL_OK")
</pallas_src>

<mosaic_0001>
module attributes {stable_mosaic.version = 11 : i64} {
  func.func @_chomp_kernel(%arg0: i32, %arg1: memref<128x16xf32, #tpu.memory_space<vmem>>, %arg2: memref<128x12xf32, #tpu.memory_space<vmem>>) attributes {dimension_semantics = [#tpu.dimension_semantics<parallel>], iteration_bounds = array<i64: 1>, scalar_prefetch = 0 : i64, scratch_operands = 0 : i64, tpu.core_type = #tpu.core_type<tc>, window_params = [{transform_indices = @transform_0, window_bounds = array<i64: 128, 16>}, {transform_indices = @transform_1, window_bounds = array<i64: 128, 12>}]} {
    %c0 = arith.constant 0 : index
    %c0_0 = arith.constant 0 : index
    %0 = vector.load %arg1[%c0, %c0_0] : memref<128x16xf32, #tpu.memory_space<vmem>>, vector<128x12xf32>
    %c0_1 = arith.constant 0 : index
    %c0_2 = arith.constant 0 : index
    %1 = vector.load %arg2[%c0_1, %c0_2] : memref<128x12xf32, #tpu.memory_space<vmem>>, vector<128x12xf32>
    tpu.vector_store %arg2[%c0_1, %c0_2], %0 {strides = array<i32>} : memref<128x12xf32, #tpu.memory_space<vmem>>, vector<128x12xf32>,
    return
  }
  func.func @transform_0(%arg0: i32) -> (i32, i32) {
    %c0_i32 = arith.constant 0 : i32
    %c0_i32_0 = arith.constant 0 : i32
    return %arg0, %c0_i32 : i32, i32
  }
  func.func @transform_1(%arg0: i32) -> (i32, i32) {
    %c0_i32 = arith.constant 0 : i32
    %c0_i32_0 = arith.constant 0 : i32
    return %arg0, %c0_i32 : i32, i32
  }
}

</mosaic_0001>

<bundles_post_ra>
// kernel: tpu_custom_call.1
= control target key start
LH: loop header
LB: loop body
LE: loop exit
PB: predicated region body
PF: predicated region fallthrough
CT: control target
= control target key end

     0   :  { %vm24_vm0 = vcmask 97280   ;;  %s167_s0 = inlined_call_operand.vmem [shape: f32[128,16], index: 0, kind: input, shape index: {}]   ;;  %s168_s1 = inlined_call_operand.vmem [shape: f32[128,12], index: 1, kind: output, shape index: {}]  }
   0x1   :  { %v8_v0 = vld [vmem:[%s167_s0] sm:$0xff]  ;;  %v9_v1 = vld [vmem:[%s167_s0 + $0x8] sm:$0xff]  ;;  %v10_v2 = vld [vmem:[%s167_s0 + $0x10] sm:$0xff] }
   0x2   :  { %25 = vst.msk [vmem:[%s168_s1] sm:$0xff] %vm24_vm0, %v8_v0  ;;  %26 = vst.msk [vmem:[%s168_s1 + $0x8] sm:$0xff] %vm24_vm0, %v9_v1  ;;  %v11_v3 = vld [vmem:[%s167_s0 + $0x18] sm:$0xff]  ;;  %v12_v4 = vld [vmem:[%s167_s0 + $0x20] sm:$0xff] }
   0x3   :  { %27 = vst.msk [vmem:[%s168_s1 + $0x10] sm:$0xff] %vm24_vm0, %v10_v2  ;;  %v13_v5 = vld [vmem:[%s167_s0 + $0x28] sm:$0xff]  ;;  %28 = vst.msk [vmem:[%s168_s1 + $0x18] sm:$0xff] %vm24_vm0, %v11_v3  ;;  %v14_v6 = vld [vmem:[%s167_s0 + $0x30] sm:$0xff] }
   0x4   :  { %29 = vst.msk [vmem:[%s168_s1 + $0x20] sm:$0xff] %vm24_vm0, %v12_v4  ;;  %30 = vst.msk [vmem:[%s168_s1 + $0x28] sm:$0xff] %vm24_vm0, %v13_v5  ;;  %v15_v7 = vld [vmem:[%s167_s0 + $0x38] sm:$0xff]  ;;  %v16_v8 = vld [vmem:[%s167_s0 + $0x40] sm:$0xff] }
   0x5   :  { %31 = vst.msk [vmem:[%s168_s1 + $0x30] sm:$0xff] %vm24_vm0, %v14_v6  ;;  %32 = vst.msk [vmem:[%s168_s1 + $0x38] sm:$0xff] %vm24_vm0, %v15_v7  ;;  %v17_v9 = vld [vmem:[%s167_s0 + $0x48] sm:$0xff]  ;;  %v18_v10 = vld [vmem:[%s167_s0 + $0x50] sm:$0xff] }
   0x6   :  { %33 = vst.msk [vmem:[%s168_s1 + $0x40] sm:$0xff] %vm24_vm0, %v16_v8  ;;  %v19_v11 = vld [vmem:[%s167_s0 + $0x58] sm:$0xff]  ;;  %34 = vst.msk [vmem:[%s168_s1 + $0x48] sm:$0xff] %vm24_vm0, %v17_v9  ;;  %v20_v12 = vld [vmem:[%s167_s0 + $0x60] sm:$0xff] }
   0x7   :  { %35 = vst.msk [vmem:[%s168_s1 + $0x50] sm:$0xff] %vm24_vm0, %v18_v10  ;;  %36 = vst.msk [vmem:[%s168_s1 + $0x58] sm:$0xff] %vm24_vm0, %v19_v11  ;;  %v21_v13 = vld [vmem:[%s167_s0 + $0x68] sm:$0xff]  ;;  %v22_v14 = vld [vmem:[%s167_s0 + $0x70] sm:$0xff] }
   0x8   :  { %37 = vst.msk [vmem:[%s168_s1 + $0x60] sm:$0xff] %vm24_vm0, %v20_v12  ;;  %38 = vst.msk [vmem:[%s168_s1 + $0x68] sm:$0xff] %vm24_vm0, %v21_v13  ;;  %v23_v15 = vld [vmem:[%s167_s0 + $0x78] sm:$0xff] }
   0x9   :  { %39 = vst.msk [vmem:[%s168_s1 + $0x70] sm:$0xff] %vm24_vm0, %v22_v14  ;;  %40 = vst.msk [vmem:[%s168_s1 + $0x78] sm:$0xff] %vm24_vm0, %v23_v15 }

</bundles_post_ra>
